<compile_context>
chip_gen: v7x
topology: tpu7x:2x2x1
jax: 0.10.0
libtpu: 0.0.40
codegen_flags: <defaults>
</compile_context>

<pallas_src>
import functools

import jax
import jax.numpy as jnp
from jax.experimental import pallas as pl
from jax.experimental.pallas import tpu as pltpu


# ---------------------------------------------------------------------------
# In-kernel math helpers (traced inside the Pallas kernel)
# ---------------------------------------------------------------------------
def _layernorm(x, gamma, beta, eps=1e-5):
    # x: (S, D), gamma/beta: (1, D) -- matches torch.nn.LayerNorm (biased variance)
    mu = jnp.mean(x, axis=-1, keepdims=True)
    var = jnp.mean((x - mu) ** 2, axis=-1, keepdims=True)
    return (x - mu) * jax.lax.rsqrt(var + eps) * gamma + beta


def _gelu_tanh(x):
    # tanh-form GELU: transcendental lands on the EUP slot instead of a long VALU erf polynomial.
    # Max deviation from torch.nn.GELU()'s exact-erf form is ~1e-3 (within test tolerance).
    c = 0.7978845608028654  # sqrt(2/pi)
    return 0.5 * x * (1.0 + jnp.tanh(c * (x + 0.044715 * x * x * x)))


# ---------------------------------------------------------------------------
# Pallas kernel: one batch element (S, D) per grid step
# ---------------------------------------------------------------------------
def encoder_block_kernel(x_ref, g1_ref, be1_ref,
                         wqkv_ref, bqkv_ref,
                         g2_ref, be2_ref,
                         w1_ref, b1_ref, w2_ref, b2_ref,
                         out_ref, *, n_heads, d_head):
    x = x_ref[...]                                  # (S, D) f32, one sequence
    S = x.shape[0]
    D = n_heads * d_head

    # ---- norm1 ----
    xn = _layernorm(x, g1_ref[...], be1_ref[...])   # (S, D) f32

    # ---- fused QKV projection (block-diagonal == per-head nn.Linear's);
    #      1/sqrt(d_head) already folded into the Q columns/bias at pack time ----
    qkv = jnp.dot(xn.astype(jnp.bfloat16), wqkv_ref[...],
                  preferred_element_type=jnp.float32) + bqkv_ref[...]    # (S, 3D) f32

    # single bf16 cast for all heads, then head-batched attention (no per-head loop)
    qkv = qkv.astype(jnp.bfloat16)
    q = qkv[:, 0 * D:1 * D].reshape(S, n_heads, d_head)   # (S, H, dh)
    k = qkv[:, 1 * D:2 * D].reshape(S, n_heads, d_head)
    v = qkv[:, 2 * D:3 * D].reshape(S, n_heads, d_head)

    # scores: contract last axes directly (no explicit K transpose in user code)
    s = jnp.einsum('qhd,khd->hqk', q, k,
                   preferred_element_type=jnp.float32)                   # (H, S, S) f32
    s = s - jnp.max(s, axis=-1, keepdims=True)
    p = jnp.exp(s)
    p = p * pl.reciprocal(jnp.sum(p, axis=-1, keepdims=True), approx=True)
    o = jnp.einsum('hqk,khd->qhd', p.astype(jnp.bfloat16), v,
                   preferred_element_type=jnp.float32)                   # (S, H, dh) f32
    attn = o.reshape(S, D)

    out1 = x + attn                                 # residual 1

    # ---- norm2 + MLP ----
    xn2 = _layernorm(out1, g2_ref[...], be2_ref[...])
    hmid = jnp.dot(xn2.astype(jnp.bfloat16), w1_ref[...],
                   preferred_element_type=jnp.float32) + b1_ref[...]     # (S, Hmlp)
    gmid = _gelu_tanh(hmid)
    mlp = jnp.dot(gmid.astype(jnp.bfloat16), w2_ref[...],
                  preferred_element_type=jnp.float32) + b2_ref[...]      # (S, D)

    out_ref[...] = out1 + mlp                       # residual 2


# ---------------------------------------------------------------------------
# One-time weight packing (hoisted out of the per-call path)
# ---------------------------------------------------------------------------
def _block_diag(w):
    # w: (n_heads, dh, dh) -> block-diagonal (D, D)
    n, dh, _ = w.shape
    D = n * dh
    out = jnp.zeros((D, D), w.dtype)
    for h in range(n):
        out = out.at[h * dh:(h + 1) * dh, h * dh:(h + 1) * dh].set(w[h])
    return out


def pack_params(params):
    """Build fused / pre-cast weights once. Call this once, NOT per forward."""
    n_heads, d_head, _ = params["wq"].shape
    D = n_heads * d_head
    inv_sqrt_dh = 1.0 / (d_head ** 0.5)

    # fold 1/sqrt(d_head) into the Q block-columns and Q bias (one-time, weight-side)
    wqkv = jnp.concatenate(
        [_block_diag(params["wq"]) * inv_sqrt_dh,
         _block_diag(params["wk"]),
         _block_diag(params["wv"])], axis=1).astype(jnp.bfloat16)        # (D, 3D) bf16
    bqkv = jnp.concatenate(
        [params["bq"].reshape(1, D) * inv_sqrt_dh,
         params["bk"].reshape(1, D),
         params["bv"].reshape(1, D)], axis=1).astype(jnp.float32)        # (1, 3D) f32

    return {
        "g1": params["g1"], "be1": params["be1"],
        "g2": params["g2"], "be2": params["be2"],
        "wqkv": wqkv, "bqkv": bqkv,
        "w1": params["w1"].astype(jnp.bfloat16), "bb1": params["bb1"],
        "w2": params["w2"].astype(jnp.bfloat16), "bb2": params["bb2"],
    }


# ---------------------------------------------------------------------------
# Wrapper: flatten batch into M, grid over batch ("parallel" -> 2 TCs on v7x)
# ---------------------------------------------------------------------------
def transformer_encoder_block(x, packed, *, n_heads, d_head):
    B, S, D = x.shape
    H = packed["w1"].shape[1]

    # collapse batch into the M dimension; each grid step sees one (S, D) sequence
    x2 = x.reshape(B * S, D)

    row_spec = pl.BlockSpec((S, D), lambda b: (b, 0))

    def wspec(shape):
        return pl.BlockSpec(shape, lambda b, _s=shape: (0,) * len(_s))

    grid_spec = pltpu.PrefetchScalarGridSpec(
        num_scalar_prefetch=0,
        grid=(B,),
        in_specs=[
            row_spec,                              # x (one sequence per step)
            wspec((1, D)), wspec((1, D)),          # gamma1, beta1
            wspec((D, 3 * D)), wspec((1, 3 * D)),  # fused wqkv (bf16), bqkv
            wspec((1, D)), wspec((1, D)),          # gamma2, beta2
            wspec((D, H)), wspec((1, H)),          # w1 (bf16), b1
            wspec((H, D)), wspec((1, D)),          # w2 (bf16), b2
        ],
        out_specs=row_spec,
    )

    kernel = functools.partial(encoder_block_kernel, n_heads=n_heads, d_head=d_head)

    out2 = pl.pallas_call(
        kernel,
        out_shape=jax.ShapeDtypeStruct((B * S, D), jnp.float32),
        grid_spec=grid_spec,
        compiler_params=pltpu.CompilerParams(dimension_semantics=("parallel",)),
    )(x2,
      packed["g1"], packed["be1"],
      packed["wqkv"], packed["bqkv"],
      packed["g2"], packed["be2"],
      packed["w1"], packed["bb1"], packed["w2"], packed["bb2"])

    return out2.reshape(B, S, D)


# ---------------------------------------------------------------------------
# Pure-JAX reference (mirrors the PyTorch forward exactly, f32 + exact-erf GELU)
# ---------------------------------------------------------------------------
def reference_forward(x, p):
    def ln(t, g, b):
        mu = jnp.mean(t, axis=-1, keepdims=True)
        var = jnp.mean((t - mu) ** 2, axis=-1, keepdims=True)
        return (t - mu) * jax.lax.rsqrt(var + 1e-5) * g + b

    n_heads, d_head, _ = p["wq"].shape
    xn = ln(x, p["g1"], p["be1"])
    heads = []
    for h in range(n_heads):
        xh = xn[:, :, h * d_head:(h + 1) * d_head]
        q = xh @ p["wq"][h] + p["bq"][h]
        k = xh @ p["wk"][h] + p["bk"][h]
        v = xh @ p["wv"][h] + p["bv"][h]
        s = jnp.einsum("bqd,bkd->bqk", q, k) / (d_head ** 0.5)
        a = jax.nn.softmax(s, axis=-1)
        heads.append(jnp.einsum("bqk,bkd->bqd", a, v))
    out1 = x + jnp.concatenate(heads, axis=-1)
    xn2 = ln(out1, p["g2"], p["be2"])
    hmid = xn2 @ p["w1"] + p["bb1"]
    gmid = 0.5 * hmid * (1.0 + jax.scipy.special.erf(hmid / jnp.sqrt(2.0)))
    return out1 + (gmid @ p["w2"] + p["bb2"])


# ---------------------------------------------------------------------------
# Deterministic parameter construction (synthetic; mirrors module shapes)
# ---------------------------------------------------------------------------
def make_params(key, D, n_heads, mlp_ratio):
    d_head = D // n_heads
    H = mlp_ratio * D
    keys = jax.random.split(key, 10)

    def lin(k, fan_in, shape):
        bound = 1.0 / (fan_in ** 0.5)
        return jax.random.uniform(k, shape, jnp.float32, -bound, bound)

    return {
        # LayerNorm defaults (weight=1, bias=0), kept (1, D) for TPU layout
        "g1": jnp.ones((1, D), jnp.float32), "be1": jnp.zeros((1, D), jnp.float32),
        "g2": jnp.ones((1, D), jnp.float32), "be2": jnp.zeros((1, D), jnp.float32),
        # Per-head q/k/v projections, stored (n_heads, in=d_head, out=d_head)
        "wq": lin(keys[0], d_head, (n_heads, d_head, d_head)),
        "bq": lin(keys[1], d_head, (n_heads, d_head)),
        "wk": lin(keys[2], d_head, (n_heads, d_head, d_head)),
        "bk": lin(keys[3], d_head, (n_heads, d_head)),
        "wv": lin(keys[4], d_head, (n_heads, d_head, d_head)),
        "bv": lin(keys[5], d_head, (n_heads, d_head)),
        # MLP: Linear(D, H) -> GELU -> Linear(H, D), weights stored (in, out)
        "w1": lin(keys[6], D, (D, H)), "bb1": lin(keys[7], D, (1, H)),
        "w2": lin(keys[8], H, (H, D)), "bb2": lin(keys[9], H, (1, D)),
    }


if __name__ == "__main__":
    B, S, D = 2, 8, 32           # batch, sequence length, hidden_dimension
    n_heads, mlp_ratio = 4, 4    # d_head = 8, mlp hidden = 128
    d_head = D // n_heads

    key = jax.random.PRNGKey(0)
    kx, kp = jax.random.split(key)
    x = jax.random.normal(kx, (B, S, D), jnp.float32)
    params = make_params(kp, D, n_heads, mlp_ratio)

    # One-time weight pack (block-diag fuse, bf16 cast, 1/sqrt(d_head) fold) — hoisted.
    packed = jax.block_until_ready(pack_params(params))

    fwd = jax.jit(functools.partial(transformer_encoder_block,
                                    n_heads=n_heads, d_head=d_head))
    out = jax.block_until_ready(fwd(x, packed))
    ref = jax.block_until_ready(reference_forward(x, params))

    assert out.shape == (B, S, D)
    # Tolerance covers bf16 MXU operands (f32 accumulation), approx reciprocal
    # (softmax rows sum to 1 +- ~2^-12), and tanh-GELU vs the exact-erf f32 reference.
    assert jnp.allclose(out, ref, atol=5e-2, rtol=5e-2), "kernel mismatch vs reference"

    print("KERNEL_OK")
</pallas_src>

<mosaic_0001>
module attributes {stable_mosaic.version = 11 : i64} {
  func.func @encoder_block_kernel(%arg0: i32, %arg1: memref<8x32xf32, #tpu.memory_space<vmem>>, %arg2: memref<1x32xf32, #tpu.memory_space<vmem>>, %arg3: memref<1x32xf32, #tpu.memory_space<vmem>>, %arg4: memref<32x96xbf16, #tpu.memory_space<vmem>>, %arg5: memref<1x96xf32, #tpu.memory_space<vmem>>, %arg6: memref<1x32xf32, #tpu.memory_space<vmem>>, %arg7: memref<1x32xf32, #tpu.memory_space<vmem>>, %arg8: memref<32x128xbf16, #tpu.memory_space<vmem>>, %arg9: memref<1x128xf32, #tpu.memory_space<vmem>>, %arg10: memref<128x32xbf16, #tpu.memory_space<vmem>>, %arg11: memref<1x32xf32, #tpu.memory_space<vmem>>, %arg12: memref<8x32xf32, #tpu.memory_space<vmem>>) attributes {dimension_semantics = [#tpu.dimension_semantics<parallel>], iteration_bounds = array<i64: 2>, scalar_prefetch = 0 : i64, scratch_operands = 0 : i64, tpu.core_type = #tpu.core_type<tc>, window_params = [{transform_indices = @transform_0, window_bounds = array<i64: 8, 32>}, {pipeline_mode = #tpu.pipeline_mode<synchronous>, transform_indices = @transform_1, window_bounds = array<i64: 1, 32>}, {pipeline_mode = #tpu.pipeline_mode<synchronous>, transform_indices = @transform_2, window_bounds = array<i64: 1, 32>}, {pipeline_mode = #tpu.pipeline_mode<synchronous>, transform_indices = @transform_3, window_bounds = array<i64: 32, 96>}, {pipeline_mode = #tpu.pipeline_mode<synchronous>, transform_indices = @transform_4, window_bounds = array<i64: 1, 96>}, {pipeline_mode = #tpu.pipeline_mode<synchronous>, transform_indices = @transform_5, window_bounds = array<i64: 1, 32>}, {pipeline_mode = #tpu.pipeline_mode<synchronous>, transform_indices = @transform_6, window_bounds = array<i64: 1, 32>}, {pipeline_mode = #tpu.pipeline_mode<synchronous>, transform_indices = @transform_7, window_bounds = array<i64: 32, 128>}, {pipeline_mode = #tpu.pipeline_mode<synchronous>, transform_indices = @transform_8, window_bounds = array<i64: 1, 128>}, {pipeline_mode = #tpu.pipeline_mode<synchronous>, transform_indices = @transform_9, window_bounds = array<i64: 128, 32>}, {pipeline_mode = #tpu.pipeline_mode<synchronous>, transform_indices = @transform_10, window_bounds = array<i64: 1, 32>}, {transform_indices = @transform_11, window_bounds = array<i64: 8, 32>}]} {
    %c0 = arith.constant 0 : index
    %c0_0 = arith.constant 0 : index
    %0 = vector.load %arg1[%c0, %c0_0] : memref<8x32xf32, #tpu.memory_space<vmem>>, vector<8x32xf32>
    %c0_1 = arith.constant 0 : index
    %c0_2 = arith.constant 0 : index
    %1 = vector.load %arg2[%c0_1, %c0_2] : memref<1x32xf32, #tpu.memory_space<vmem>>, vector<1x32xf32>
    %c0_3 = arith.constant 0 : index
    %c0_4 = arith.constant 0 : index
    %2 = vector.load %arg3[%c0_3, %c0_4] : memref<1x32xf32, #tpu.memory_space<vmem>>, vector<1x32xf32>
    %cst = arith.constant dense<0.000000e+00> : vector<8xf32>
    %3 = vector.multi_reduction <add>, %0, %cst [1] : vector<8x32xf32> to vector<8xf32>
    %4 = vector.shape_cast %3 : vector<8xf32> to vector<8x1xf32>
    %cst_5 = arith.constant 3.200000e+01 : f32
    %5 = vector.broadcast %cst_5 : f32 to vector<8x1xf32>
    %6 = arith.divf %4, %5 : vector<8x1xf32>
    %7 = vector.broadcast %6 : vector<8x1xf32> to vector<8x32xf32>
    %8 = arith.subf %0, %7 : vector<8x32xf32>
    %9 = arith.mulf %8, %8 : vector<8x32xf32>
    %cst_6 = arith.constant dense<0.000000e+00> : vector<8xf32>
    %10 = vector.multi_reduction <add>, %9, %cst_6 [1] : vector<8x32xf32> to vector<8xf32>
    %11 = vector.shape_cast %10 : vector<8xf32> to vector<8x1xf32>
    %cst_7 = arith.constant 3.200000e+01 : f32
    %12 = vector.broadcast %cst_7 : f32 to vector<8x1xf32>
    %13 = arith.divf %11, %12 : vector<8x1xf32>
    %14 = vector.broadcast %6 : vector<8x1xf32> to vector<8x32xf32>
    %15 = arith.subf %0, %14 : vector<8x32xf32>
    %cst_8 = arith.constant 9.99999974E-6 : f32
    %16 = vector.broadcast %cst_8 : f32 to vector<8x1xf32>
    %17 = arith.addf %13, %16 : vector<8x1xf32>
    %18 = math.rsqrt %17 : vector<8x1xf32>
    %19 = vector.broadcast %18 : vector<8x1xf32> to vector<8x32xf32>
    %20 = arith.mulf %15, %19 : vector<8x32xf32>
    %21 = vector.broadcast %1 : vector<1x32xf32> to vector<8x32xf32>
    %22 = arith.mulf %20, %21 : vector<8x32xf32>
    %23 = vector.broadcast %2 : vector<1x32xf32> to vector<8x32xf32>
    %24 = arith.addf %22, %23 : vector<8x32xf32>
    %25 = arith.truncf %24 : vector<8x32xf32> to vector<8x32xbf16>
    %c0_9 = arith.constant 0 : index
    %c0_10 = arith.constant 0 : index
    %26 = vector.load %arg4[%c0_9, %c0_10] : memref<32x96xbf16, #tpu.memory_space<vmem>>, vector<32x96xbf16>
    %cst_11 = arith.constant dense<0.000000e+00> : vector<8x96xf32>
    %27 = tpu.matmul %25, %26, %cst_11 {dimension_numbers = #tpu.dot_dimension_numbers<[1], [0], [0], [1], [0, 0, 1, 1], [], []>} : vector<8x32xbf16>, vector<32x96xbf16>, vector<8x96xf32> -> vector<8x96xf32>
    %c0_12 = arith.constant 0 : index
    %c0_13 = arith.constant 0 : index
    %28 = vector.load %arg5[%c0_12, %c0_13] : memref<1x96xf32, #tpu.memory_space<vmem>>, vector<1x96xf32>
    %29 = vector.broadcast %28 : vector<1x96xf32> to vector<8x96xf32>
    %30 = arith.addf %27, %29 : vector<8x96xf32>
    %31 = arith.truncf %30 : vector<8x96xf32> to vector<8x96xbf16>
    %32 = vector.extract_strided_slice %31 {offsets = [0, 0], sizes = [8, 32], strides = [1, 1]} : vector<8x96xbf16> to vector<8x32xbf16>
    %33 = vector.shape_cast %32 : vector<8x32xbf16> to vector<8x4x8xbf16>
    %34 = vector.extract_strided_slice %31 {offsets = [0, 32], sizes = [8, 32], strides = [1, 1]} : vector<8x96xbf16> to vector<8x32xbf16>
    %35 = vector.shape_cast %34 : vector<8x32xbf16> to vector<8x4x8xbf16>
    %36 = vector.extract_strided_slice %31 {offsets = [0, 64], sizes = [8, 32], strides = [1, 1]} : vector<8x96xbf16> to vector<8x32xbf16>
    %37 = vector.shape_cast %36 : vector<8x32xbf16> to vector<8x4x8xbf16>
    "tpu.trace_start"() <{level = 10 : i32, message = "qhd,khd->hqk"}> : () -> ()
    %cst_14 = arith.constant dense<0.000000e+00> : vector<4x8x8xf32>
    %38 = tpu.matmul %33, %35, %cst_14 {dimension_numbers = #tpu.dot_dimension_numbers<[2], [2], [0], [0], [0, 1, 0, 0, 1, 0], [1], [1]>} : vector<8x4x8xbf16>, vector<8x4x8xbf16>, vector<4x8x8xf32> -> vector<4x8x8xf32>
    "tpu.trace_stop"() : () -> ()
    %cst_15 = arith.constant dense<0xFF800000> : vector<4x8xf32>
    %39 = vector.multi_reduction <maximumf>, %38, %cst_15 [2] : vector<4x8x8xf32> to vector<4x8xf32>
    %40 = vector.shape_cast %39 : vector<4x8xf32> to vector<4x8x1xf32>
    %41 = vector.broadcast %40 : vector<4x8x1xf32> to vector<4x8x8xf32>
    %42 = arith.subf %38, %41 : vector<4x8x8xf32>
    %43 = math.exp %42 : vector<4x8x8xf32>
    %cst_16 = arith.constant dense<0.000000e+00> : vector<4x8xf32>
    %44 = vector.multi_reduction <add>, %43, %cst_16 [2] : vector<4x8x8xf32> to vector<4x8xf32>
    %45 = vector.shape_cast %44 : vector<4x8xf32> to vector<4x8x1xf32>
    %46 = tpu.reciprocal %45 {approx = true} : vector<4x8x1xf32> -> vector<4x8x1xf32>
    %47 = vector.broadcast %46 : vector<4x8x1xf32> to vector<4x8x8xf32>
    %48 = arith.mulf %43, %47 : vector<4x8x8xf32>
    %49 = arith.truncf %48 : vector<4x8x8xf32> to vector<4x8x8xbf16>
    "tpu.trace_start"() <{level = 10 : i32, message = "hqk,khd->qhd"}> : () -> ()
    %cst_17 = arith.constant dense<0.000000e+00> : vector<4x8x8xf32>
    %50 = tpu.matmul %37, %49, %cst_17 {dimension_numbers = #tpu.dot_dimension_numbers<[0], [2], [2], [1], [0, 1, 0, 2, 1, 1], [1], [0]>} : vector<8x4x8xbf16>, vector<4x8x8xbf16>, vector<4x8x8xf32> -> vector<4x8x8xf32>
    %51 = tpu.transpose %50, [2, 0, 1] : vector<4x8x8xf32> -> vector<8x4x8xf32>
    "tpu.trace_stop"() : () -> ()
    %52 = vector.shape_cast %51 : vector<8x4x8xf32> to vector<8x32xf32>
    %53 = arith.addf %0, %52 : vector<8x32xf32>
    %c0_18 = arith.constant 0 : index
    %c0_19 = arith.constant 0 : index
    %54 = vector.load %arg6[%c0_18, %c0_19] : memref<1x32xf32, #tpu.memory_space<vmem>>, vector<1x32xf32>
    %c0_20 = arith.constant 0 : index
    %c0_21 = arith.constant 0 : index
    %55 = vector.load %arg7[%c0_20, %c0_21] : memref<1x32xf32, #tpu.memory_space<vmem>>, vector<1x32xf32>
    %cst_22 = arith.constant dense<0.000000e+00> : vector<8xf32>
    %56 = vector.multi_reduction <add>, %53, %cst_22 [1] : vector<8x32xf32> to vector<8xf32>
    %57 = vector.shape_cast %56 : vector<8xf32> to vector<8x1xf32>
    %cst_23 = arith.constant 3.200000e+01 : f32
    %58 = vector.broadcast %cst_23 : f32 to vector<8x1xf32>
    %59 = arith.divf %57, %58 : vector<8x1xf32>
    %60 = vector.broadcast %59 : vector<8x1xf32> to vector<8x32xf32>
    %61 = arith.subf %53, %60 : vector<8x32xf32>
    %62 = arith.mulf %61, %61 : vector<8x32xf32>
    %cst_24 = arith.constant dense<0.000000e+00> : vector<8xf32>
    %63 = vector.multi_reduction <add>, %62, %cst_24 [1] : vector<8x32xf32> to vector<8xf32>
    %64 = vector.shape_cast %63 : vector<8xf32> to vector<8x1xf32>
    %cst_25 = arith.constant 3.200000e+01 : f32
    %65 = vector.broadcast %cst_25 : f32 to vector<8x1xf32>
    %66 = arith.divf %64, %65 : vector<8x1xf32>
    %67 = vector.broadcast %59 : vector<8x1xf32> to vector<8x32xf32>
    %68 = arith.subf %53, %67 : vector<8x32xf32>
    %cst_26 = arith.constant 9.99999974E-6 : f32
    %69 = vector.broadcast %cst_26 : f32 to vector<8x1xf32>
    %70 = arith.addf %66, %69 : vector<8x1xf32>
    %71 = math.rsqrt %70 : vector<8x1xf32>
    %72 = vector.broadcast %71 : vector<8x1xf32> to vector<8x32xf32>
    %73 = arith.mulf %68, %72 : vector<8x32xf32>
    %74 = vector.broadcast %54 : vector<1x32xf32> to vector<8x32xf32>
    %75 = arith.mulf %73, %74 : vector<8x32xf32>
    %76 = vector.broadcast %55 : vector<1x32xf32> to vector<8x32xf32>
    %77 = arith.addf %75, %76 : vector<8x32xf32>
    %78 = arith.truncf %77 : vector<8x32xf32> to vector<8x32xbf16>
    %c0_27 = arith.constant 0 : index
    %c0_28 = arith.constant 0 : index
    %79 = vector.load %arg8[%c0_27, %c0_28] : memref<32x128xbf16, #tpu.memory_space<vmem>>, vector<32x128xbf16>
    %cst_29 = arith.constant dense<0.000000e+00> : vector<8x128xf32>
    %80 = tpu.matmul %78, %79, %cst_29 {dimension_numbers = #tpu.dot_dimension_numbers<[1], [0], [0], [1], [0, 0, 1, 1], [], []>} : vector<8x32xbf16>, vector<32x128xbf16>, vector<8x128xf32> -> vector<8x128xf32>
    %c0_30 = arith.constant 0 : index
    %c0_31 = arith.constant 0 : index
    %81 = vector.load %arg9[%c0_30, %c0_31] : memref<1x128xf32, #tpu.memory_space<vmem>>, vector<1x128xf32>
    %82 = vector.broadcast %81 : vector<1x128xf32> to vector<8x128xf32>
    %83 = arith.addf %80, %82 : vector<8x128xf32>
    %cst_32 = arith.constant 5.000000e-01 : f32
    %84 = vector.broadcast %cst_32 : f32 to vector<8x128xf32>
    %85 = arith.mulf %84, %83 : vector<8x128xf32>
    %cst_33 = arith.constant 4.471500e-02 : f32
    %86 = vector.broadcast %cst_33 : f32 to vector<8x128xf32>
    %87 = arith.mulf %86, %83 : vector<8x128xf32>
    %88 = arith.mulf %87, %83 : vector<8x128xf32>
    %89 = arith.mulf %88, %83 : vector<8x128xf32>
    %90 = arith.addf %83, %89 : vector<8x128xf32>
    %cst_34 = arith.constant 0.797884583 : f32
    %91 = vector.broadcast %cst_34 : f32 to vector<8x128xf32>
    %92 = arith.mulf %91, %90 : vector<8x128xf32>
    %93 = math.tanh %92 : vector<8x128xf32>
    %cst_35 = arith.constant 1.000000e+00 : f32
    %94 = vector.broadcast %cst_35 : f32 to vector<8x128xf32>
    %95 = arith.addf %94, %93 : vector<8x128xf32>
    %96 = arith.mulf %85, %95 : vector<8x128xf32>
    %97 = arith.truncf %96 : vector<8x128xf32> to vector<8x128xbf16>
    %c0_36 = arith.constant 0 : index
    %c0_37 = arith.constant 0 : index
    %98 = vector.load %arg10[%c0_36, %c0_37] : memref<128x32xbf16, #tpu.memory_space<vmem>>, vector<128x32xbf16>
    %cst_38 = arith.constant dense<0.000000e+00> : vector<8x32xf32>
    %99 = tpu.matmul %97, %98, %cst_38 {dimension_numbers = #tpu.dot_dimension_numbers<[1], [0], [0], [1], [0, 0, 1, 1], [], []>} : vector<8x128xbf16>, vector<128x32xbf16>, vector<8x32xf32> -> vector<8x32xf32>
    %c0_39 = arith.constant 0 : index
    %c0_40 = arith.constant 0 : index
    %100 = vector.load %arg11[%c0_39, %c0_40] : memref<1x32xf32, #tpu.memory_space<vmem>>, vector<1x32xf32>
    %101 = vector.broadcast %100 : vector<1x32xf32> to vector<8x32xf32>
    %102 = arith.addf %99, %101 : vector<8x32xf32>
    %103 = arith.addf %53, %102 : vector<8x32xf32>
    %c0_41 = arith.constant 0 : index
    %c0_42 = arith.constant 0 : index
    %104 = vector.load %arg12[%c0_41, %c0_42] : memref<8x32xf32, #tpu.memory_space<vmem>>, vector<8x32xf32>
    tpu.vector_store %arg12[%c0_41, %c0_42], %103 {strides = array<i32>} : memref<8x32xf32, #tpu.memory_space<vmem>>, vector<8x32xf32>,
    return
  }
  func.func @transform_0(%arg0: i32) -> (i32, i32) {
    %c0_i32 = arith.constant 0 : i32
    %c0_i32_0 = arith.constant 0 : i32
    return %arg0, %c0_i32 : i32, i32
  }
  func.func @transform_1(%arg0: i32) -> (i32, i32) {
    %c0_i32 = arith.constant 0 : i32
    %c0_i32_0 = arith.constant 0 : i32
    %c0_i32_1 = arith.constant 0 : i32
    return %c0_i32, %c0_i32_0 : i32, i32
  }
  func.func @transform_2(%arg0: i32) -> (i32, i32) {
    %c0_i32 = arith.constant 0 : i32
    %c0_i32_0 = arith.constant 0 : i32
    %c0_i32_1 = arith.constant 0 : i32
    return %c0_i32, %c0_i32_0 : i32, i32
  }
  func.func @transform_3(%arg0: i32) -> (i32, i32) {
    %c0_i32 = arith.constant 0 : i32
    %c0_i32_0 = arith.constant 0 : i32
    %c0_i32_1 = arith.constant 0 : i32
    return %c0_i32, %c0_i32_0 : i32, i32
  }
  func.func @transform_4(%arg0: i32) -> (i32, i32) {
    %c0_i32 = arith.constant 0 : i32
    %c0_i32_0 = arith.constant 0 : i32
    %c0_i32_1 = arith.constant 0 : i32
    return %c0_i32, %c0_i32_0 : i32, i32
  }
  func.func @transform_5(%arg0: i32) -> (i32, i32) {
    %c0_i32 = arith.constant 0 : i32
    %c0_i32_0 = arith.constant 0 : i32
    %c0_i32_1 = arith.constant 0 : i32
    return %c0_i32, %c0_i32_0 : i32, i32
  }
  func.func @transform_6(%arg0: i32) -> (i32, i32) {
    %c0_i32 = arith.constant 0 : i32
    %c0_i32_0 = arith.constant 0 : i32
    %c0_i32_1 = arith.constant 0 : i32
    return %c0_i32, %c0_i32_0 : i32, i32
  }
  func.func @transform_7(%arg0: i32) -> (i32, i32) {
    %c0_i32 = arith.constant 0 : i32
    %c0_i32_0 = arith.constant 0 : i32
    %c0_i32_1 = arith.constant 0 : i32
    return %c0_i32, %c0_i32_0 : i32, i32
  }
  func.func @transform_8(%arg0: i32) -> (i32, i32) {
    %c0_i32 = arith.constant 0 : i32
    %c0_i32_0 = arith.constant 0 : i32
    %c0_i32_1 = arith.constant 0 : i32
    return %c0_i32, %c0_i32_0 : i32, i32
  }
  func.func @transform_9(%arg0: i32) -> (i32, i32) {
    %c0_i32 = arith.constant 0 : i32
    %c0_i32_0 = arith.constant 0 : i32
    %c0_i32_1 = arith.constant 0 : i32
    return %c0_i32, %c0_i32_0 : i32, i32
  }
  func.func @transform_10(%arg0: i32) -> (i32, i32) {
    %c0_i32 = arith.constant 0 : i32
    %c0_i32_0 = arith.constant 0 : i32
    %c0_i32_1 = arith.constant 0 : i32
    return %c0_i32, %c0_i32_0 : i32, i32
  }
  func.func @transform_11(%arg0: i32) -> (i32, i32) {
    %c0_i32 = arith.constant 0 : i32
    %c0_i32_0 = arith.constant 0 : i32
    return %arg0, %c0_i32 : i32, i32
  }
}

</mosaic_0001>

<bundles_post_ra>
// kernel: transformer_encoder_block.1
= control target key start
LH: loop header
LB: loop body
LE: loop exit
PB: predicated region body
PF: predicated region fallthrough
CT: control target
= control target key end

     0   :  { %s2277_s0 = inlined_call_operand.vmem [shape: f32[16,32], index: 0, kind: input, shape index: {}]   ;;  %s2278_s1 = inlined_call_operand.vmem [shape: f32[1,32], index: 1, kind: input, shape index: {}]   ;;  %s2279_s2 = inlined_call_operand.vmem [shape: f32[1,32], index: 2, kind: input, shape index: {}]   ;;  %s2280_s3 = inlined_call_operand.vmem [shape: bf16[32,96], index: 3, kind: input, shape index: {}]   ;;  %s2281_s4 = inlined_call_operand.vmem [shape: f32[1,96], index: 4, kind: input, shape index: {}]   ;;  %s2282_s5 = inlined_call_operand.vmem [shape: f32[1,32], index: 5, kind: input, shape index: {}]   ;;  %s2283_s6 = inlined_call_operand.vmem [shape: f32[1,32], index: 6, kind: input, shape index: {}]   ;;  %s2284_s7 = inlined_call_operand.vmem [shape: bf16[32,128], index: 7, kind: input, shape index: {}]   ;;  %s2285_s8 = inlined_call_operand.vmem [shape: f32[1,128], index: 8, kind: input, shape index: {}]   ;;  %s2286_s9 = inlined_call_operand.vmem [shape: bf16[128,32], index: 9, kind: input, shape index: {}]   ;;  %s2287_s10 = inlined_call_operand.vmem [shape: f32[1,32], index: 10, kind: input, shape index: {}]   ;;  %s2288_s11 = inlined_call_operand.hbm [shape: f32[16,32], index: 11, kind: output, shape index: {}]  }
   0x1   :  { %2289 = sst [smem:[#allocation5_spill]] %s2277_s0 }
   0x2   :  { %16 = vsyncpa [#allocation3], 0 }
   0x3   :  { %18 = vsyncpa [#allocation3 + $0x1], 0  ;;  %s2013_s17 = smov 0   ;;  %s2015_s18 = smov 0  }
   0x4   :  { %s2017_s19 = smov 0   ;;  %s2019_s20 = smov 0  }
   0x5 LB: > { %s2034_s21 = sadd.s32 4294967295, %s1938_s20   ;;  %s1634_s22 = sadd.s32 4294967294, %s1938_s20   ;;  %s1938_s20 = sphi %s2019_s20, %s2296_s20   ;;  %s1934_s19 = sphi %s2017_s19, %s2295_s19   ;;  %s1930_s18 = sphi %s2015_s18, %s2294_s18   ;;  %s1926_s17 = sphi %s2013_s17, %s2293_s17  }
   0x6   : > { %s2038_s23 = sadd.s32 1, %s1938_s20   ;;  %s267_s24 = sadd.s32 1, %s1934_s19 }
   0x7   : > { %s264_s25 = ssub.s32 %s1938_s20, %s2038_s23  ;;  %p277_p0 = scmp.ne.s32.totalorder %s1934_s19, %s1930_s18 }
   0x8   : > { %p265_p1 = scmp.eq.s32.totalorder %s264_s25, 0  ;;  %p278_p2 = scmp.eq.s32.totalorder %s2034_s21, 1 }
   0x9   : > { %p283_p3 = scmp.ne.s32.totalorder %s1930_s18, %s1926_s17  ;;  %p284_p4 = scmp.eq.s32.totalorder %s1634_s22, 1 }
   0xa   : > { %s2049_s26 = scalar_select %p265_p1, %s1934_s19, %s267_s24  }
   0xb   : > { %p2051_p5 = por %p278_p2, %p277_p0  ;;  %p2055_p6 = por %p284_p4, %p283_p3 }
   0xc   : > { %p1637_p7 = scmp.ge.s32.totalorder %s1938_s20, 1  ;;  %p339_p8 = scmp.lt.s32.totalorder %s1938_s20, 3 }
   0xe   : > { %p340_p9 = pnand %p1637_p7, %p339_p8 }
   0xf   : > { %p378_p10 = scmp.lt.s32.totalorder (!%p340_p9), %s2034_s21, 1  ;;  %vm386_vm0 = vcmask (!%p340_p9), 261120   ;;  %s2292_s0 = sld [smem:[#allocation5_spill]] (!%p340_p9)  ;;  %v1842_v7 = vld [vmem:[%s2280_s3] sm:$0xff] (!%p340_p9)   ;;  %v1940_v8 = vmov (!%p340_p9), 0.0   ;;  %vm1941_vm1 = vmmov (!%p340_p9), 0  }
  0x10   : > { %343 = sbr.rel (%p340_p9) target bundleno = 2783 (0xadf), region = 64  ;;  %1706 = vmatprep.subr.bf16.mxu0 (!%p340_p9), %v1940_v8  ;;  %1710 = vmatprep.mubr.msk.bf16.mxu0 (!%p340_p9), %vm1941_vm1, %v1940_v8  ;;  %v1843_v9 = vld [vmem:[%s2280_s3 + $0x8] sm:$0xff] (!%p340_p9)   ;;  %v1640_v14 = vld [vmem:[%s2278_s1] ss:$0 sm:$0xff] (!%p340_p9)  ;;  %s1942_s15 = smov (!%p340_p9), 104   ;;  %vm570_vm2 = vcmask (!%p340_p9), 1043456  }
  0x11   : > { %1707 = vmatpush3.bf16.msra.mxu0 (!%p340_p9), %v1842_v7  ;;  %1732 = vmatprep.subr.bf16.mxu1 (!%p340_p9), %v1940_v8  ;;  %v1641_v16 = vld [vmem:[%s2279_s2] ss:$0 sm:$0xff] (!%p340_p9)  ;;  %s1943_s16 = smov (!%p340_p9), 120   ;;  %s1944_s22 = smov (!%p340_p9), 112   ;;  %vm566_vm3 = vcmask (!%p340_p9), 64512   ;;  %vm1337_vm4 = vcmask (!%p340_p9), 130048  }
  0x12   : > { %1708 = vmatprep.subr.bf16.mxu0 (!%p340_p9), %v1940_v8  ;;  %1734 = vmatprep.mubr.msk.bf16.mxu1 (!%p340_p9), %vm1941_vm1, %v1940_v8  ;;  %v1642_v20 = vld [vmem:[%s2281_s4] ss:$0 sm:$0xff] (!%p340_p9)  ;;  %s1945_s24 = smov (!%p340_p9), 96   ;;  %s1946_s25 = smov (!%p340_p9), 64   ;;  %vm1339_vm5 = vcmask (!%p340_p9), 195584  }
  0x13   : > { %s1951_s12 = smov (!%p340_p9), 24   ;;  %s1672_s13 = sshll.u32 (!%p340_p9), %s2034_s21, 7 }
  0x15   : > { %1709 = vmatpush3.bf16.msra.mxu0 (!%p340_p9), %v1843_v9 }
  0x16   : > { %1714 = vmatprep.subr.bf16.mxu0 (!%p340_p9), %v1940_v8 }
  0x17   : > { %s379_s29 = scalar_select %p378_p10, %s2034_s21, 1 }
  0x19   : > { %s1639_s30 = sshll.u32 %s379_s29, 3  ;;  %s1949_s29 = smov 16  }
  0x1a   : > { %s381_s14 = scalar_lea.vmem %s2292_s0, %s1639_s30  ;;  %s1950_s30 = smov 8  }
  0x1b   : > { %v2066_v0 = vld [vmem:[%s381_s14] sm:$0xff] }
  0x1c   : > { %v387_v1 = vsel %vm386_vm0, %v2066_v0, 0.0 }
  0x1d   : > { %388 = vadd.xlane.f32.xlu0 %v387_v1 }
  0xaa   : > { %v389_v2 = vpop.xlane.xlu0 %388 }
  0xab   : > { %v391_v3 = vmul.f32 0.03125, %v389_v2 }
  0xad   : > { %v392_v4 = vsub.f32 %v2066_v0, %v391_v3 }
  0xaf   : > { %v393_v5 = vmul.f32 %v392_v4, %v392_v4 }
  0xb1   : > { %v394_v6 = vsel %vm386_vm0, %v393_v5, 0.0 }
  0xb2   : > { %395 = vadd.xlane.f32.xlu0 %v394_v6 }
 0x13f   : > { %v396_v10 = vpop.xlane.xlu0 %395 }
 0x140   : > { %v397_v11 = vmul.f32 0.03125, %v396_v10 }
 0x142   : > { %v398_v12 = vadd.f32 1e-05, %v397_v11 }
 0x144   : > { %1854 = vrsqrt.f32 %v398_v12 }
 0x14e   : > { %v1855_v13 = vpop.eup %1854 }
 0x14f   : > { %v400_v15 = vmul.f32 %v1855_v13, %v392_v4 }
 0x151   : > { %v407_v17 = vmul.f32 %v1640_v14, %v400_v15 }
 0x153   : > { %v414_v18 = vadd.f32 %v1641_v16, %v407_v17 }
 0x155   : > { %v415_v19 = vpack.c.bf16 %v414_v18, %v414_v18 }
 0x157   : > { %1711 = vmatmul.mubr.msk.bf16.vlgmr.msra.gmra.mrb[0].mxu0 %vm386_vm0, %v415_v19 }
 0x158   : > { %1716 = vmatprep.mubr.msk.bf16.mxu0 %vm1941_vm1, %v1940_v8 }
 0x22a   : > { %v476_v21 = vpop.f32.mrb[0].mxu0 }
 0x22b   : > { %v477_v22 = vadd.f32 %v1642_v20, %v476_v21  ;;  %v1712_v23 = vpop.f32.mrb[1].mxu0 }
 0x22c   : > { %v479_v24 = vpop.f32.mrb[2].mxu0 }
 0x22d   : > { %v2098_v25 = vpack.c.bf16 %v477_v22, %v477_v22  ;;  %v1713_v26 = vpop.f32.mrb[3].mxu0 }
 0x22f   : > { %488 = vrot.lane.b32.xlu0 %v2098_v25, %s1942_s15  ;;  %484 = vrot.lane.b32.xlu1 %v2098_v25, %s1943_s16 }
 0x233   : > { %486 = vrot.lane.b32.xlu1 %v2098_v25, %s1944_s22 }
 0x237   : > { %490 = vrot.lane.b32.xlu1 %v2098_v25, %s1945_s24 }
 0x2a1   : > { %v2104_v27 = vpop.permute.xlu1 %484  ;;  %v2110_v29 = vpop.permute.xlu0 %488 }
 0x2a2   : > { %492 = vrot.lane.b32.xlu1 %v2104_v27, %s1945_s24 }
 0x2a5   : > { %v2107_v28 = vpop.permute.xlu1 %486 }
 0x2a6   : > { %494 = vrot.lane.b32.xlu1 %v2107_v28, %s1945_s24 }
 0x2a9   : > { %v491_v30 = vpop.permute.xlu1 %490 }
 0x2aa   : > { %496 = vrot.lane.b32.xlu1 %v2110_v29, %s1945_s24  ;;  %s2234_s24 = scalar_lea.hbm %s2288_s11, %s1672_s13 }
 0x2cd   : > { %502 = vxpose.xlu1.c.b16.start.end [1/1] (short) (narrow) %v491_v30, 16 }
 0x314   : > { %v493_v31 = vpop.permute.xlu1 %492 }
 0x315   : > { %518 = vxpose.xlu0.c.b16.start.end [1/1] (short) (narrow) %v493_v31, 16 }
 0x318   : > { %v495_v32 = vpop.permute.xlu1 %494 }
 0x319   : > { %534 = vxpose.xlu1.c.b16.start.end [1/1] (short) (narrow) %v495_v32, 16 }
 0x31c   : > { %v497_v33 = vpop.permute.xlu1 %496 }
 0x31d   : > { %550 = vxpose.xlu0.c.b16.start.end [1/1] (short) (narrow) %v497_v33, 16 }
 0x333   : > { %v510_v34 = vpop.trf.xlu1 }
 0x334   : > { %v572_v35 = vsel %vm570_vm2, %v510_v34, 0 }
 0x335   : > { %1715 = vmatpush3.bf16.msra.mxu0 %v572_v35 }
 0x336   : > { %1720 = vmatprep.subr.bf16.mxu0 %v1940_v8 }
 0x338   : > { %1717 = vmatmul.mubr.msk.bf16.vlgmr.msra.gmra.mrb[4].mxu0 %vm566_vm3, %v2098_v25 }
 0x339   : > { %1722 = vmatprep.mubr.msk.bf16.mxu0 %vm1941_vm1, %v1940_v8 }
 0x37b   : > { %v526_v36 = vpop.trf.xlu0 }
 0x37c   : > { %v618_v37 = vsel %vm570_vm2, %v526_v36, 0 }
 0x37d   : > { %1721 = vmatpush3.bf16.msra.mxu0 %v618_v37 }
 0x37e   : > { %1726 = vmatprep.subr.bf16.mxu0 %v1940_v8 }
 0x37f   : > { %v542_v38 = vpop.trf.xlu1 }
 0x380   : > { %1723 = vmatmul.mubr.msk.bf16.vlgmr.msra.gmra.mrb[8].mxu0 %vm566_vm3, %v2104_v27  ;;  %v664_v39 = vsel %vm570_vm2, %v542_v38, 0 }
 0x381   : > { %1727 = vmatpush3.bf16.msra.mxu0 %v664_v39  ;;  %1728 = vmatprep.mubr.msk.bf16.mxu0 %vm1941_vm1, %v1940_v8 }
 0x382   : > { %1738 = vmatprep.subr.bf16.mxu0 %v1940_v8 }
 0x383   : > { %v558_v40 = vpop.trf.xlu0 }
 0x384   : > { %v710_v41 = vsel %vm570_vm2, %v558_v40, 0 }
 0x385   : > { %1733 = vmatpush3.bf16.msra.mxu1 %v710_v41 }
 0x386   : > { %1744 = vmatprep.subr.bf16.mxu1 %v1940_v8 }
 0x388   : > { %1729 = vmatmul.mubr.msk.bf16.vlgmr.msra.gmra.mrb[12].mxu0 %vm566_vm3, %v2107_v28  ;;  %1735 = vmatmul.mubr.msk.bf16.vlgmr.msra.gmra.mrb[0].mxu1 %vm566_vm3, %v2110_v29 }
 0x389   : > { %1740 = vmatprep.mubr.msk.bf16.mxu0 %vm1941_vm1, %v1940_v8  ;;  %1746 = vmatprep.mubr.msk.bf16.mxu1 %vm1941_vm1, %v1940_v8 }
 0x40b   : > { %v608_v42 = vpop.f32.mrb[4].mxu0 }
 0x40c   : > { %v1718_v43 = vpop.f32.mrb[5].mxu0  ;;  %v752_v44 = vsel %vm566_vm3, %v608_v42, -inf }
 0x40d   : > { %753 = vmax.xlane.f32.xlu1 %v752_v44  ;;  %v611_v45 = vpop.f32.mrb[6].mxu0 }
 0x40e   : > { %v1719_v46 = vpop.f32.mrb[7].mxu0 }
 0x453   : > { %v654_v47 = vpop.f32.mrb[8].mxu0 }
 0x454   : > { %v1724_v48 = vpop.f32.mrb[9].mxu0  ;;  %v755_v49 = vsel %vm566_vm3, %v654_v47, -inf }
 0x455   : > { %756 = vmax.xlane.f32.xlu0 %v755_v49  ;;  %v657_v50 = vpop.f32.mrb[10].mxu0 }
 0x456   : > { %v1725_v51 = vpop.f32.mrb[11].mxu0 }
 0x45b   : > { %v700_v52 = vpop.f32.mrb[12].mxu0  ;;  %v746_v53 = vpop.f32.mrb[0].mxu1 }
 0x45c   : > { %v1730_v54 = vpop.f32.mrb[13].mxu0  ;;  %v1736_v55 = vpop.f32.mrb[1].mxu1  ;;  %v761_v56 = vsel %vm566_vm3, %v746_v53, -inf  ;;  %v758_v57 = vsel %vm566_vm3, %v700_v52, -inf }
 0x45d   : > { %v749_v58 = vpop.f32.mrb[2].mxu1  ;;  %762 = vmax.xlane.f32.xlu0 %v761_v56  ;;  %759 = vmax.xlane.f32.xlu1 %v758_v57  ;;  %v703_v59 = vpop.f32.mrb[14].mxu0 }
 0x45e   : > { %v1731_v60 = vpop.f32.mrb[15].mxu0  ;;  %v1737_v61 = vpop.f32.mrb[3].mxu1 }
 0x46e   : > { %800 = vrot.lane.b32.xlu1 %v2098_v25, %s1946_s25 }
 0x473   : > { %802 = vrot.lane.b32.xlu0 %v2104_v27, %s1946_s25 }
 0x49a   : > { %v754_v62 = vpop.xlane.xlu1 %753 }
 0x49b   : > { %v764_v63 = vsub.f32 %v608_v42, %v754_v62 }
 0x49d   : > { %v768_v1 = vmul.f32 1.442695, %v764_v63 }
 0x49f   : > { %1856 = vpow2.f32 %v768_v1 }
 0x4a9   : > { %v1857_v2 = vpop.eup %1856 }
 0x4aa   : > { %v776_v3 = vsel %vm566_vm3, %v1857_v2, 0.0 }
 0x4ab   : > { %777 = vadd.xlane.f32.xlu1 %v776_v3 }
 0x4bc   : > { %804 = vrot.lane.b32.xlu1 %v2107_v28, %s1946_s25 }
 0x4e2   : > { %v757_v4 = vpop.xlane.xlu0 %756 }
 0x4e3   : > { %v765_v5 = vsub.f32 %v654_v47, %v757_v4  ;;  %v1193_v4 = vlaneseq }
 0x4e5   : > { %v770_v6 = vmul.f32 1.442695, %v765_v5 }
 0x4e7   : > { %1858 = vpow2.f32 %v770_v6  ;;  %v1948_v6 = vmov 1934713408  }
 0x4ea   : > { %v760_v7 = vpop.xlane.xlu1 %759  ;;  %v763_v15 = vpop.xlane.xlu0 %762 }
 0x4eb   : > { %v766_v9 = vsub.f32 %v700_v52, %v760_v7  ;;  %v767_v16 = vsub.f32 %v746_v53, %v763_v15  ;;  %v1223_v7 = vunpack.c.l.s4 %v1948_v6 }
 0x4ed   : > { %v772_v10 = vmul.f32 1.442695, %v766_v9  ;;  %v774_v17 = vmul.f32 1.442695, %v767_v16 }
 0x4ee   : > { %v801_v20 = vpop.permute.xlu1 %800  ;;  %v803_v27 = vpop.permute.xlu0 %802 }
 0x4ef   : > { %1860 = vpow2.f32 %v772_v10  ;;  %v1194_v10 = vshrl.u32 %v1193_v4, 7 }
 0x4f0   : > { %1862 = vpow2.f32 %v774_v17 }
 0x4f1   : > { %v1859_v11 = vpop.eup %1858 }
 0x4f2   : > { %v779_v12 = vsel %vm566_vm3, %v1859_v11, 0.0 }
 0x4f3   : > { %780 = vadd.xlane.f32.xlu0 %v779_v12  ;;  %v1224_v12 = vunpack.c.0.s8 %v1223_v7 }
 0x4f9   : > { %v1861_v13 = vpop.eup %1860 }
 0x4fa   : > { %v782_v14 = vsel %vm566_vm3, %v1861_v13, 0.0  ;;  %v1863_v18 = vpop.eup %1862 }
 0x4fb   : > { %783 = vadd.xlane.f32.xlu1 %v782_v14  ;;  %v785_v19 = vsel %vm566_vm3, %v1863_v18, 0.0 }
 0x509   : > { %806 = vrot.lane.b32.xlu0 %v2110_v29, %s1946_s25  ;;  %s375_s25 = sand.u32 1, %s1930_s18  }
 0x50a   : > { %s1562_s21 = scalar_lea.sflag [#allocation3], %s375_s25 }
 0x528   : > { %786 = vadd.xlane.f32.xlu0 %v785_v19  ;;  %812 = vxpose.xlu1.c.b16.start.end [1/1] (short) (narrow) %v801_v20, 16  ;;  %v1227_v19 = vsub.s32 %v1224_v12, %v1194_v10 }
 0x538   : > { %v778_v21 = vpop.xlane.xlu1 %777 }
 0x539   : > { %1864 = vrcp.f32 %v778_v21 }
 0x53c   : > { %v805_v22 = vpop.permute.xlu1 %804 }
 0x53d   : > { %844 = vxpose.xlu1.c.b16.start.end [1/1] (short) (narrow) %v805_v22, 16 }
 0x543   : > { %v1865_v23 = vpop.eup %1864 }
 0x544   : > { %v792_v24 = vmul.f32 %v1865_v23, %v1857_v2  ;;  %v1947_v2 = vmov 1983009808  }
 0x545   : > { %v1191_v3 = vunpack.c.l.s4 %v1947_v2  ;;  %v1844_v2 = vld [vmem:[%s2284_s7] sm:$0xff]  }
 0x546   : > { %v796_v25 = vpack.c.bf16 %v792_v24, %v792_v24 }
 0x547   : > { %v1192_v9 = vunpack.c.0.s8 %v1191_v3  ;;  %v1846_v3 = vld [vmem:[%s2286_s9] sm:$0xff]  }
 0x548   : > { %v880_v26 = vsel %vm566_vm3, %v796_v25, 0 }
 0x549   : > { %1739 = vmatpush3.bf16.xpose.msra.mxu0 %v880_v26 }
 0x54a   : > { %1750 = vmatprep.subr.bf16.mxu0 %v1940_v8 }
 0x555   : > { %828 = vxpose.xlu0.c.b16.start.end [1/1] (short) (narrow) %v803_v27, 16 }
 0x580   : > { %v781_v28 = vpop.xlane.xlu0 %780 }
 0x581   : > { %1866 = vrcp.f32 %v781_v28 }
 0x584   : > { %v807_v29 = vpop.permute.xlu0 %806 }
 0x585   : > { %860 = vxpose.xlu0.c.b16.start.end [1/1] (short) (narrow) %v807_v29, 16 }
 0x588   : > { %v784_v30 = vpop.xlane.xlu1 %783 }
 0x589   : > { %1868 = vrcp.f32 %v784_v30 }
 0x58b   : > { %v1867_v31 = vpop.eup %1866 }
 0x58c   : > { %v793_v32 = vmul.f32 %v1867_v31, %v1859_v11 }
 0x58e   : > { %v797_v33 = vpack.c.bf16 %v793_v32, %v793_v32  ;;  %v820_v34 = vpop.trf.xlu1 }
 0x58f   : > { %1741 = vmatmul.mubr.msk.bf16.vlgmr.msra.gmra.mrb[16].mxu0 %vm566_vm3, %v820_v34 }
 0x590   : > { %v926_v35 = vsel %vm566_vm3, %v797_v33, 0  ;;  %1752 = vmatprep.mubr.msk.bf16.mxu0 %vm1941_vm1, %v1940_v8 }
 0x591   : > { %1745 = vmatpush3.bf16.xpose.msra.mxu1 %v926_v35 }
 0x592   : > { %1756 = vmatprep.subr.bf16.mxu1 %v1940_v8 }
 0x593   : > { %v1869_v36 = vpop.eup %1868 }
 0x594   : > { %v794_v37 = vmul.f32 %v1869_v36, %v1861_v13  ;;  %v1195_v13 = vsub.s32 %v1192_v9, %v1194_v10  ;;  %v1656_v9 = vld [vmem:[%s2282_s5] ss:$0 sm:$0xff] }
 0x596   : > { %v798_v38 = vpack.c.bf16 %v794_v37, %v794_v37 }
 0x598   : > { %v972_v39 = vsel %vm566_vm3, %v798_v38, 0 }
 0x599   : > { %1751 = vmatpush3.bf16.xpose.msra.mxu0 %v972_v39 }
 0x59a   : > { %1762 = vmatprep.subr.bf16.mxu0 %v1940_v8 }
 0x5a3   : > { %v852_v40 = vpop.trf.xlu1 }
 0x5a4   : > { %1753 = vmatmul.mubr.msk.bf16.vlgmr.msra.gmra.mrb[20].mxu0 %vm566_vm3, %v852_v40 }
 0x5a5   : > { %1766 = vmatprep.mubr.msk.bf16.mxu0 %vm1941_vm1, %v1940_v8  ;;  %1763 = vmatpush3.bf16.msra.mxu0 %v1844_v2 }
 0x5a6   : > { %1764 = vmatprep.subr.bf16.mxu0 %v1940_v8 }
 0x5b5   : > { %v787_v41 = vpop.xlane.xlu0 %786 }
 0x5b6   : > { %1870 = vrcp.f32 %v787_v41 }
 0x5bb   : > { %v836_v42 = vpop.trf.xlu0 }
 0x5bc   : > { %1747 = vmatmul.mubr.msk.bf16.vlgmr.msra.gmra.mrb[4].mxu1 %vm566_vm3, %v836_v42 }
 0x5bd   : > { %1758 = vmatprep.mubr.msk.bf16.mxu1 %vm1941_vm1, %v1940_v8 }
 0x5c0   : > { %v1871_v43 = vpop.eup %1870 }
 0x5c1   : > { %v795_v44 = vmul.f32 %v1871_v43, %v1863_v18 }
 0x5c3   : > { %v799_v45 = vpack.c.bf16 %v795_v44, %v795_v44 }
 0x5c5   : > { %v1018_v46 = vsel %vm566_vm3, %v799_v45, 0 }
 0x5c6   : > { %1757 = vmatpush3.bf16.xpose.msra.mxu1 %v1018_v46 }
 0x5c7   : > { %1770 = vmatprep.subr.bf16.mxu1 %v1940_v8 }
 0x5eb   : > { %v868_v47 = vpop.trf.xlu0 }
 0x5ec   : > { %1759 = vmatmul.mubr.msk.bf16.vlgmr.msra.gmra.mrb[8].mxu1 %vm566_vm3, %v868_v47 }
 0x5ed   : > { %1786 = vmatprep.mubr.msk.bf16.mxu1 %vm1941_vm1, %v1940_v8  ;;  %1771 = vmatpush3.bf16.msra.mxu1 %v1846_v3 }
 0x5ee   : > { %1772 = vmatprep.subr.bf16.mxu1 %v1940_v8 }
 0x662   : > { %v916_v48 = vpop.f32.mrb[16].mxu0 }
 0x663   : > { %v1742_v49 = vpop.f32.mrb[17].mxu0  ;;  %1060 = vxpose.xlu1.b32.start.end [1/1] (short) (narrow) %v916_v48, 8 }
 0x664   : > { %v919_v50 = vpop.f32.mrb[18].mxu0 }
 0x665   : > { %v1743_v51 = vpop.f32.mrb[19].mxu0 }
 0x677   : > { %v1008_v52 = vpop.f32.mrb[20].mxu0 }
 0x678   : > { %v1754_v53 = vpop.f32.mrb[21].mxu0 }
 0x679   : > { %v1011_v54 = vpop.f32.mrb[22].mxu0 }
 0x67a   : > { %v1755_v55 = vpop.f32.mrb[23].mxu0 }
 0x68f   : > { %v962_v56 = vpop.f32.mrb[4].mxu1 }
 0x690   : > { %1092 = vxpose.xlu0.b32.start.end [1/1] (short) (narrow) %v962_v56, 8  ;;  %v1748_v57 = vpop.f32.mrb[5].mxu1 }
 0x691   : > { %v965_v58 = vpop.f32.mrb[6].mxu1 }
 0x692   : > { %v1749_v59 = vpop.f32.mrb[7].mxu1 }
 0x694   : > { %1124 = vxpose.xlu0.b32.start.end [1/1] (short) (narrow) %v1008_v52, 8 }
 0x6bf   : > { %v1054_v60 = vpop.f32.mrb[8].mxu1 }
 0x6c0   : > { %1156 = vxpose.xlu0.b32.start.end [1/1] (short) (narrow) %v1054_v60, 8  ;;  %v1760_v61 = vpop.f32.mrb[9].mxu1 }
 0x6c1   : > { %v1057_v62 = vpop.f32.mrb[10].mxu1 }
 0x6c2   : > { %v1761_v63 = vpop.f32.mrb[11].mxu1 }
 0x6e3   : > { %v1076_v11 = vpop.trf.xlu1 }
 0x710   : > { %v1108_v1 = vpop.trf.xlu0 }
 0x714   : > { %v1140_v5 = vpop.trf.xlu0 }
 0x715   : > { %v1188_v14 = vcombine.low %v1076_v11, %v1140_v5  ;;  %v1189_v15 = vcombine.high %v1076_v11, %v1140_v5  ;;  %v1657_v11 = vld [vmem:[%s2283_s6] ss:$0 sm:$0xff] }
 0x717   : > { %v1196_v20 = vrot.slane %v1188_v14, %v1195_v13  ;;  %v1203_v21 = vrot.slane %v1189_v15, %v1195_v13  ;;  %v1847_v15 = vld [vmem:[%s2286_s9 + $0x8] sm:$0xff]  }
 0x718   : > { %1773 = vmatpush3.bf16.msra.mxu1 %v1847_v15 }
 0x719   : > { %1774 = vmatprep.subr.bf16.mxu1 %v1940_v8 }
 0x740   : > { %v1172_v16 = vpop.trf.xlu0 }
 0x741   : > { %v1204_v17 = vcombine.low %v1108_v1, %v1172_v16  ;;  %v1205_v18 = vcombine.high %v1108_v1, %v1172_v16  ;;  %v1848_v16 = vld [vmem:[%s2286_s9 + $0x10] sm:$0xff]  }
 0x742   : > { %1775 = vmatpush3.bf16.msra.mxu1 %v1848_v16 }
 0x743   : > { %v1212_v22 = vrot.slane %v1204_v17, %v1195_v13  ;;  %v1219_v23 = vrot.slane %v1205_v18, %v1195_v13  ;;  %1776 = vmatprep.subr.bf16.mxu1 %v1940_v8  ;;  %v1849_v17 = vld [vmem:[%s2286_s9 + $0x18] sm:$0xff]   ;;  %v1850_v18 = vld [vmem:[%s2286_s9 + $0x20] sm:$0xff]  }
 0x745   : > { %v1220_v24 = vcombine.low %v1196_v20, %v1212_v22  ;;  %v1221_v25 = vcombine.high %v1196_v20, %v1212_v22  ;;  %v1236_v26 = vcombine.low %v1203_v21, %v1219_v23  ;;  %v1237_v27 = vcombine.high %v1203_v21, %v1219_v23  ;;  %v1852_v20 = vld [vmem:[%s2286_s9 + $0x30] sm:$0xff]   ;;  %v1853_v21 = vld [vmem:[%s2286_s9 + $0x38] sm:$0xff]   ;;  %v1658_v22 = vld [vmem:[%s2285_s8] ss:$0 sm:$0xff] }
 0x746   : > { %1777 = vmatpush3.bf16.msra.mxu1 %v1849_v17 }
 0x747   : > { %v1228_v28 = vrot.slane %v1220_v24, %v1227_v19  ;;  %v1235_v29 = vrot.slane %v1221_v25, %v1227_v19  ;;  %v1244_v30 = vrot.slane %v1236_v26, %v1227_v19  ;;  %v1251_v31 = vrot.slane %v1237_v27, %v1227_v19  ;;  %1778 = vmatprep.subr.bf16.mxu1 %v1940_v8 }
 0x749   : > { %v1256_v32 = vcombine.low %v1228_v28, %v1235_v29  ;;  %v1654_v33 = vcombine.high %v1228_v28, %v1235_v29  ;;  %v1272_v34 = vcombine.low %v1244_v30, %v1251_v31  ;;  %v1655_v35 = vcombine.high %v1244_v30, %v1251_v31 }
 0x74a   : > { %1779 = vmatpush3.bf16.msra.mxu1 %v1850_v18 }
 0x74b   : > { %v1263_v36 = vrot.slane %v1256_v32, %v1195_v13  ;;  %v1271_v37 = vrot.slane %v1654_v33, %v1195_v13  ;;  %v1279_v38 = vrot.slane %v1272_v34, %v1195_v13  ;;  %v1287_v39 = vrot.slane %v1655_v35, %v1195_v13  ;;  %1780 = vmatprep.subr.bf16.mxu1 %v1940_v8 }
 0x74d   : > { %v1289_v40 = vcombine.high %v1263_v36, %v1271_v37  ;;  %v1305_v41 = vcombine.high %v1279_v38, %v1287_v39  ;;  %v1288_v42 = vcombine.low %v1263_v36, %v1271_v37  ;;  %v1304_v43 = vcombine.low %v1279_v38, %v1287_v39  ;;  %v1662_v37 = vld [vmem:[%s2287_s10] ss:$0 sm:$0xff] }
 0x74f   : > { %v1303_v44 = vrot.slane %v1289_v40, %v1227_v19  ;;  %v1319_v45 = vrot.slane %v1305_v41, %v1227_v19  ;;  %v1296_v46 = vrot.slane %v1288_v42, %v1227_v19  ;;  %v1312_v47 = vrot.slane %v1304_v43, %v1227_v19  ;;  %v1851_v19 = vld [vmem:[%s2286_s9 + $0x28] sm:$0xff]  }
 0x750   : > { %1781 = vmatpush3.bf16.msra.mxu1 %v1851_v19 }
 0x751   : > { %v1322_v48 = vcombine.low %v1303_v44, %v1319_v45  ;;  %v1321_v49 = vcombine.high %v1296_v46, %v1312_v47  ;;  %v1320_v50 = vcombine.low %v1296_v46, %v1312_v47  ;;  %v1323_v51 = vcombine.high %v1303_v44, %v1319_v45  ;;  %1782 = vmatprep.subr.bf16.mxu1 %v1940_v8 }
 0x753   : > { %1329 = vrot.lane.b32.xlu0 %v1322_v48, %s1949_s29  ;;  %1325 = vrot.lane.b32.xlu1 %v1321_v49, %s1950_s30  ;;  %s1638_s29 = sshll.u32 %s375_s25, 3  ;;  %s1952_s30 = smov [#allocation2]  }
 0x754   : > { %1783 = vmatpush3.bf16.msra.mxu1 %v1852_v20  ;;  %s377_s14 = scalar_lea.vmem [#allocation2], %s1638_s29 }
 0x755   : > { %1784 = vmatprep.subr.bf16.mxu1 %v1940_v8  ;;  %s1575_s15 = sshll.u32 %s377_s14, 4  ;;  %s2236_s15 = int_to_ptr.vmem [resolvable:$true] %s1575_s15 }
 0x756   : > { %s1876_s29 = scalar_lea.vmem %s2236_s15, 128 }
 0x757   : > { %1333 = vrot.lane.b32.xlu1 %v1323_v51, %s1951_s12  ;;  %p1877_p11 = scmp.ne.s32.totalorder %s2236_s15, %s1876_s29  ;;  %s1880_s12 = sshll.u32 %s1952_s30, 4  ;;  %s1881_s12 = int_to_ptr.vmem [resolvable:$false] %s1880_s12 }
 0x758   : > { %1785 = vmatpush3.bf16.msra.mxu1 %v1853_v21  ;;  %s1882_s0 = scalar_lea.vmem %s1881_s12, 256  ;;  %p1883_p0 = scmp.lt.s32.totalorder %s2236_s15, %s1881_s12 }
 0x759   : > { %p1878_p12 = pnand %p1877_p11, %p2051_p5  ;;  %p1884_p1 = scmp.lt.s32.totalorder %s1882_s0, %s1876_s29 }
 0x75b   : > { %p1879_p13 = pneg %p1878_p12  ;;  %p1885_p2 = por %p1884_p1, %p1883_p0 }
 0x75d   : > { %p1886_p3 = pnand %p1885_p2, %p1879_p13 }
 0x7c5   : > { %v1326_v52 = vpop.permute.xlu1 %1325  ;;  %v1330_v53 = vpop.permute.xlu0 %1329 }
 0x7c6   : > { %v1336_v54 = vsel %vm566_vm3, %v1320_v50, %v1326_v52 }
 0x7c7   : > { %v1338_v56 = vsel %vm1337_vm4, %v1336_v54, %v1330_v53 }
 0x7c9   : > { %v1334_v55 = vpop.permute.xlu1 %1333 }
 0x7ca   : > { %v1340_v57 = vsel %vm1339_vm5, %v1338_v56, %v1334_v55 }
 0x7cb   : > { %v2171_v58 = vadd.f32 %v1340_v57, %v2066_v0  ;;  %v1845_v0 = vld [vmem:[%s2284_s7 + $0x8] sm:$0xff]  }
 0x7cc   : > { %1765 = vmatpush3.bf16.msra.mxu0 %v1845_v0 }
 0x7cd   : > { %v1344_v59 = vsel %vm386_vm0, %v2171_v58, 0.0 }
 0x7ce   : > { %1345 = vadd.xlane.f32.xlu1 %v1344_v59 }
 0x85b   : > { %v1346_v60 = vpop.xlane.xlu1 %1345 }
 0x85c   : > { %v1347_v61 = vmul.f32 0.03125, %v1346_v60 }
 0x85e   : > { %v1348_v62 = vsub.f32 %v2171_v58, %v1347_v61 }
 0x860   : > { %v1349_v63 = vmul.f32 %v1348_v62, %v1348_v62 }
 0x862   : > { %v1350_v1 = vsel %vm386_vm0, %v1349_v63, 0.0 }
 0x863   : > { %1351 = vadd.xlane.f32.xlu0 %v1350_v1 }
 0x8f0   : > { %v1352_v4 = vpop.xlane.xlu0 %1351 }
 0x8f1   : > { %v1353_v5 = vmul.f32 0.03125, %v1352_v4 }
 0x8f3   : > { %v1354_v6 = vadd.f32 1e-05, %v1353_v5 }
 0x8f5   : > { %1872 = vrsqrt.f32 %v1354_v6 }
 0x8ff   : > { %v1873_v7 = vpop.eup %1872 }
 0x900   : > { %v1356_v10 = vmul.f32 %v1873_v7, %v1348_v62 }
 0x902   : > { %v1363_v12 = vmul.f32 %v1656_v9, %v1356_v10 }
 0x904   : > { %v1370_v13 = vadd.f32 %v1657_v11, %v1363_v12 }
 0x906   : > { %v1371_v14 = vpack.c.bf16 %v1370_v13, %v1370_v13 }
 0x908   : > { %1767 = vmatmul.mubr.msk.bf16.vlgmr.msra.gmra.mrb[24].mxu0 %vm386_vm0, %v1371_v14 }
 0x9db   : > { %v1432_v23 = vpop.f32.mrb[24].mxu0 }
 0x9dc   : > { %v1433_v24 = vadd.f32 %v1658_v22, %v1432_v23  ;;  %v1768_v25 = vpop.f32.mrb[25].mxu0 }
 0x9dd   : > { %v1435_v26 = vpop.f32.mrb[26].mxu0 }
 0x9de   : > { %v1439_v27 = vmul.f32 0.044715, %v1433_v24  ;;  %v1769_v28 = vpop.f32.mrb[27].mxu0  ;;  %v1438_v8 = vmul.f32 0.5, %v1433_v24 }
 0x9e0   : > { %v1440_v29 = vmul.f32 %v1439_v27, %v1433_v24 }
 0x9e2   : > { %v1441_v30 = vmul.f32 %v1440_v29, %v1433_v24 }
 0x9e4   : > { %v1442_v31 = vadd.f32 %v1441_v30, %v1433_v24 }
 0x9e6   : > { %v1443_v32 = vmul.f32 0.7978846, %v1442_v31 }
 0x9e8   : > { %1874 = vtanh.f32 %v1443_v32 }
 0x9f2   : > { %v1875_v33 = vpop.eup %1874 }
 0x9f3   : > { %v1445_v34 = vadd.f32 1.0, %v1875_v33 }
 0x9f5   : > { %v1446_v35 = vmul.f32 %v1445_v34, %v1438_v8 }
 0x9f7   : > { %v1447_v36 = vpack.c.bf16 %v1446_v35, %v1446_v35 }
 0x9f9   : > { %1787 = vmatmul.mubr.bf16.vlgmr.msra.gmra.mrb[12].mxu1 %v1447_v36 }
 0xacc   : > { %v1553_v38 = vpop.f32.mrb[12].mxu1 }
 0xacd   : > { %v1554_v39 = vadd.f32 %v1662_v37, %v1553_v38  ;;  %v1788_v40 = vpop.f32.mrb[13].mxu1 }
 0xace   : > { %v1556_v41 = vpop.f32.mrb[14].mxu1 }
 0xacf   : > { %v1559_v42 = vadd.f32 %v1554_v39, %v2171_v58  ;;  %v1789_v43 = vpop.f32.mrb[15].mxu1 }
 0xad1   : > { %1560 = vst.msk [vmem:[%s377_s14] sm:$0xff] %vm386_vm0, %v1559_v42 }
 0xad2   : > { %1889 = shalt.err (!%p1886_p3)
}
 0xad3   : > { %s1890_s25 = scalar_lea.hbm %s2234_s24, 128  ;;  %s1894_s16 = scalar_lea.hbm %s2288_s11, 256 }
 0xad4   : > { %p1891_p4 = scmp.ne.s32.totalorder %s2234_s24, %s1890_s25  ;;  %p1895_p9 = scmp.lt.u32.totalorder %s2234_s24, %s2288_s11 }
 0xad5   : > { %p1896_p10 = scmp.lt.u32.totalorder %s1894_s16, %s1890_s25  ;;  %p1898_p12 = scmp.lt.u32.totalorder %s1890_s25, %s2234_s24 }
 0xad6   : > { %p1892_p7 = pnand %p1891_p4, %p2051_p5 }
 0xad7   : > { %p1897_p11 = por %p1896_p10, %p1895_p9 }
 0xad8   : > { %p1893_p8 = pneg %p1892_p7 }
 0xad9   : > { %p1899_p13 = por %p1898_p12, %p1897_p11 }
 0xadb   : > { %p1900_p0 = pnand %p1899_p13, %p1893_p8 }
 0xadd   : > { %1903 = shalt.err (!%p1900_p0)
}
 0xade   : > { %1790 = dma.vmem_to_hbm [thread:$0]  (%p2051_p5), %s2236_s15, 128, %s2234_s24, %s1562_s21  }
 0xadf PF: > { %p1796_p1 = scmp.ge.s32.totalorder %s1938_s20, 2  ;;  %s1587_s0 = sand.u32 1, %s1926_s17  }
 0xae0   : > { %s1588_s29 = scalar_lea.sflag [#allocation3], %s1587_s0 }
 0xae1   : > { %p1793_p2 = pnand %p1796_p1, %p2055_p6 }
 0xae3   : > { %1921 = dma.done.wait (!%p1793_p2), %s1588_s29, 128  }
 0xae4   : > { %1923 = vsyncadd (!%p1793_p2), %s1588_s29, 4294967168  ;;  %p21_p3 = scmp.ge.s32.totalorder %s2038_s23, 4   ;;  %s2293_s17 = smov %s1930_s18 }
 0xae5   : > { %s2294_s18 = smov %s1934_s19  ;;  %s2295_s19 = smov %s2049_s26 }
 0xae6   : > { %s2296_s20 = smov %s2038_s23  ;;  %23 = sbr.rel (!%p21_p3) target bundleno = 5 (0x5), region = 99 }
 0xaed   :  { %1593 = vsyncpa [#allocation3], 1 }
 0xaee   :  { %1595 = vsyncpa [#allocation3 + $0x1], 1 }

</bundles_post_ra>
